<compile_context>
chip_gen: v6e
topology: v6e:2x2x1
jax: 0.10.0
libtpu: 0.0.40
codegen_flags: <defaults>
</compile_context>

<pallas_src>
import functools

import jax
import jax.numpy as jnp
from jax.experimental import pallas as pl
from jax.experimental.pallas import tpu as pltpu

N, CIN, H, W = 1, 96, 1, 1
COUT = 2304


def conv1x1_sigmoid_kernel(x_ref, w_ref, b_ref, o_ref):
    # x_ref: (1, CIN) f32   w_ref: (CIN, COUT) bf16   b_ref: (1, COUT) f32
    # o_ref: (1, COUT) f32
    x = x_ref[...].astype(w_ref.dtype)                       # bf16 MXU path
    acc = jnp.dot(x, w_ref[...], preferred_element_type=jnp.float32)
    acc = acc + b_ref[...]                                    # f32 bias
    # sigmoid(z) = 1 / (1 + exp(-z)); exp and reciprocal both go to the EUP.
    o_ref[...] = pl.reciprocal(1.0 + jnp.exp(-acc), approx=True).astype(o_ref.dtype)


@functools.partial(jax.jit, static_argnames=())
def conv2d_1x1_sigmoid(x_nchw, weight_kc, bias):
    """x_nchw: (N, CIN, H, W) f32; weight_kc: (CIN, COUT) bf16; bias: (COUT,) f32."""
    n, cin, h, w = x_nchw.shape
    m = n * h * w
    cout = weight_kc.shape[1]

    # NCHW -> (M, CIN); at this problem size M == 1 (no padding needed).
    x2d = jnp.transpose(x_nchw, (0, 2, 3, 1)).reshape(m, cin)
    b2d = bias.reshape(1, cout)

    out = pl.pallas_call(
        conv1x1_sigmoid_kernel,
        out_shape=jax.ShapeDtypeStruct((m, cout), jnp.float32),
        grid_spec=pltpu.PrefetchScalarGridSpec(
            num_scalar_prefetch=0,
            grid=(1,),
            in_specs=[
                pl.BlockSpec((m, cin), lambda i: (0, 0)),      # activations
                pl.BlockSpec((cin, cout), lambda i: (0, 0)),   # K-major weight
                pl.BlockSpec((1, cout), lambda i: (0, 0)),     # bias
            ],
            out_specs=pl.BlockSpec((m, cout), lambda i: (0, 0)),
        ),
        compiler_params=pltpu.CompilerParams(
            dimension_semantics=("arbitrary",)),
    )(x2d, weight_kc, b2d)

    # (M, COUT) -> NCHW = (N, COUT, H, W)
    out = out.reshape(n, h, w, cout)
    return jnp.transpose(out, (0, 3, 1, 2))


if __name__ == "__main__":
    key = jax.random.PRNGKey(0)
    kx, kw, kb = jax.random.split(key, 3)

    # deterministic input matching torch.randn([1, 96, 1, 1])
    x = jax.random.normal(kx, (N, CIN, H, W), dtype=jnp.float32)

    # deterministic Conv2d parameters (shapes from nn.Conv2d(96, 2304, 1))
    fan_in = CIN * 1 * 1
    bound = 1.0 / (fan_in ** 0.5)
    weight = jax.random.uniform(kw, (COUT, CIN, 1, 1), jnp.float32,
                                minval=-bound, maxval=bound)
    bias = jax.random.uniform(kb, (COUT,), jnp.float32,
                              minval=-bound, maxval=bound)

    # One-time parameter prep (outside the hot path): K-major (CIN, COUT)
    # layout so the kernel's jnp.dot needs no transpose, bf16 to halve the
    # dominant weight HBM read (f32 accumulation keeps error within 2e-2).
    weight_kc_bf16 = weight.reshape(COUT, CIN).T.astype(jnp.bfloat16)

    out = conv2d_1x1_sigmoid(x, weight_kc_bf16, bias)
    jax.block_until_ready(out)

    # reference check in plain JAX (f32 reference; tolerance loosened for bf16 weights)
    ref = jax.nn.sigmoid(
        jnp.einsum("nchw,oc->nohw", x, weight.reshape(COUT, CIN))
        + bias.reshape(1, COUT, 1, 1))
    assert out.shape == (N, COUT, H, W)
    assert jnp.allclose(out, ref, atol=2e-2, rtol=2e-2), \
        float(jnp.max(jnp.abs(out - ref)))

    print("KERNEL_OK")
</pallas_src>

<mosaic_0001>
module attributes {stable_mosaic.version = 11 : i64} {
  func.func @conv1x1_sigmoid_kernel(%arg0: i32, %arg1: memref<1x96xf32, #tpu.memory_space<vmem>>, %arg2: memref<96x2304xbf16, #tpu.memory_space<vmem>>, %arg3: memref<1x2304xf32, #tpu.memory_space<vmem>>, %arg4: memref<1x2304xf32, #tpu.memory_space<vmem>>) attributes {dimension_semantics = [#tpu.dimension_semantics<arbitrary>], iteration_bounds = array<i64: 1>, scalar_prefetch = 0 : i64, scratch_operands = 0 : i64, tpu.core_type = #tpu.core_type<tc>, window_params = [{pipeline_mode = #tpu.pipeline_mode<synchronous>, transform_indices = @transform_0, window_bounds = array<i64: 1, 96>}, {pipeline_mode = #tpu.pipeline_mode<synchronous>, transform_indices = @transform_1, window_bounds = array<i64: 96, 2304>}, {pipeline_mode = #tpu.pipeline_mode<synchronous>, transform_indices = @transform_2, window_bounds = array<i64: 1, 2304>}, {pipeline_mode = #tpu.pipeline_mode<synchronous>, transform_indices = @transform_3, window_bounds = array<i64: 1, 2304>}]} {
    %c0 = arith.constant 0 : index
    %c0_0 = arith.constant 0 : index
    %0 = vector.load %arg1[%c0, %c0_0] : memref<1x96xf32, #tpu.memory_space<vmem>>, vector<1x96xf32>
    %1 = arith.truncf %0 : vector<1x96xf32> to vector<1x96xbf16>
    %c0_1 = arith.constant 0 : index
    %c0_2 = arith.constant 0 : index
    %2 = vector.load %arg2[%c0_1, %c0_2] : memref<96x2304xbf16, #tpu.memory_space<vmem>>, vector<96x2304xbf16>
    %cst = arith.constant dense<0.000000e+00> : vector<1x2304xf32>
    %3 = tpu.matmul %1, %2, %cst {dimension_numbers = #tpu.dot_dimension_numbers<[1], [0], [0], [1], [0, 0, 1, 1], [], []>} : vector<1x96xbf16>, vector<96x2304xbf16>, vector<1x2304xf32> -> vector<1x2304xf32>
    %c0_3 = arith.constant 0 : index
    %c0_4 = arith.constant 0 : index
    %4 = vector.load %arg3[%c0_3, %c0_4] : memref<1x2304xf32, #tpu.memory_space<vmem>>, vector<1x2304xf32>
    %5 = arith.addf %3, %4 : vector<1x2304xf32>
    %cst_5 = arith.constant 0.000000e+00 : f32
    %6 = vector.broadcast %cst_5 : f32 to vector<1x2304xf32>
    %7 = arith.subf %6, %5 : vector<1x2304xf32>
    %8 = math.exp %7 : vector<1x2304xf32>
    %cst_6 = arith.constant 1.000000e+00 : f32
    %9 = vector.broadcast %cst_6 : f32 to vector<1x2304xf32>
    %10 = arith.addf %9, %8 : vector<1x2304xf32>
    %11 = tpu.reciprocal %10 {approx = true} : vector<1x2304xf32> -> vector<1x2304xf32>
    %c0_7 = arith.constant 0 : index
    %c0_8 = arith.constant 0 : index
    %12 = vector.load %arg4[%c0_7, %c0_8] : memref<1x2304xf32, #tpu.memory_space<vmem>>, vector<1x2304xf32>
    tpu.vector_store %arg4[%c0_7, %c0_8], %11 {strides = array<i32>} : memref<1x2304xf32, #tpu.memory_space<vmem>>, vector<1x2304xf32>,
    return
  }
  func.func @transform_0(%arg0: i32) -> (i32, i32) {
    %c0_i32 = arith.constant 0 : i32
    %c0_i32_0 = arith.constant 0 : i32
    %c0_i32_1 = arith.constant 0 : i32
    return %c0_i32, %c0_i32_0 : i32, i32
  }
  func.func @transform_1(%arg0: i32) -> (i32, i32) {
    %c0_i32 = arith.constant 0 : i32
    %c0_i32_0 = arith.constant 0 : i32
    %c0_i32_1 = arith.constant 0 : i32
    return %c0_i32, %c0_i32_0 : i32, i32
  }
  func.func @transform_2(%arg0: i32) -> (i32, i32) {
    %c0_i32 = arith.constant 0 : i32
    %c0_i32_0 = arith.constant 0 : i32
    %c0_i32_1 = arith.constant 0 : i32
    return %c0_i32, %c0_i32_0 : i32, i32
  }
  func.func @transform_3(%arg0: i32) -> (i32, i32) {
    %c0_i32 = arith.constant 0 : i32
    %c0_i32_0 = arith.constant 0 : i32
    %c0_i32_1 = arith.constant 0 : i32
    return %c0_i32, %c0_i32_0 : i32, i32
  }
}

</mosaic_0001>

<bundles_post_ra>
// kernel: conv2d_1x1_sigmoid.1
= control target key start
LH: loop header
LB: loop body
LE: loop exit
PB: predicated region body
PF: predicated region fallthrough
CT: control target
= control target key end

     0   :  { %8 = vsyncpa [#allocation3], 0  ;;  %s1932_s0 = inlined_call_operand.vmem [shape: f32[1,96], index: 0, kind: input, shape index: {}]   ;;  %s1933_s1 = inlined_call_operand.hbm [shape: bf16[96,2304], index: 1, kind: input, shape index: {}]   ;;  %s1934_s2 = inlined_call_operand.vmem [shape: f32[1,2304], index: 2, kind: input, shape index: {}]   ;;  %s1935_s3 = inlined_call_operand.hbm [shape: f32[1,2304], index: 3, kind: output, shape index: {}]  }
   0x1   :  { %9 = vsyncpa [#allocation4], 0  ;;  %s1796_s12 = smov [#allocation2]  }
   0x2   :  { %s17_s13 = sshll.u32 %s1796_s12, 4  ;;  %s18_s13 = int_to_ptr.vmem [resolvable:$true] %s17_s13 }
   0x3   :  { %s1760_s14 = scalar_lea.vmem %s18_s13, 13824  ;;  %p1765_p1 = scmp.lt.s32.totalorder %s18_s13, %s18_s13 }
   0x4   :  { %p1761_p0 = scmp.ne.s32.totalorder %s18_s13, %s1760_s14  ;;  %p1766_p2 = scmp.lt.s32.totalorder %s1760_s14, %s1760_s14 }
   0x6   :  { %p1767_p3 = por %p1766_p2, %p1765_p1 }
   0x8   :  { %p1768_p4 = pnand %p1767_p3, %p1761_p0 }
   0xa   :  { %1771 = shalt.err (!%p1768_p4)
}
   0xb   :  { %s1797_s15 = smov 1152   ;;  %s1798_s16 = smov 72  }
   0xc   :  { %23 = dma.hbm_to_vmem [thread:$0]  %s1933_s1, 13824, %s18_s13, [#allocation3], %s1797_s15, %s1797_s15, %s1798_s16  }
   0xd   :  { %1792 = dma.done.wait [#allocation3], 13824  }
   0xe   :  { %1793 = vsyncadd [#allocation3], 4294953472  ;;  %v1799_v0 = vmov 0   ;;  %v1518_v1 = vld [vmem:[#allocation2 + $0x2d4] ss:$72 sps:$4 sm:$0xff]   ;;  %vm776_vm0 = vcmask 785408  }
   0xf   :  { %812 = vmatprep.mubr.bf16.mxu0 %v1799_v0  ;;  %853 = vmatprep.mubr.bf16.mxu1 %v1799_v0  ;;  %v1520_v2 = vld [vmem:[#allocation2 + $0x2dc] ss:$72 sps:$4 sm:$0xff]   ;;  %v1522_v3 = vld [vmem:[#allocation2 + $0x2d0] ss:$72 sps:$4 sm:$0xff]   ;;  %v1526_v6 = vld [vmem:[#allocation2 + $0x24c] ss:$72 sps:$4 sm:$0xff]  }
  0x10   :  { %784 = vmatprep.subr.bf16.mxu0 %v1518_v1  ;;  %v1523_v4 = vld [vmem:[#allocation2 + $0x2d8] ss:$72 sps:$4 sm:$0xff]   ;;  %825 = vmatprep.subr.bf16.mxu1 %v1520_v2  ;;  %v1524_v5 = vld [vmem:[#allocation2 + $0x244] ss:$72 sps:$4 sm:$0xff]   ;;  %v1529_v8 = vld [vmem:[#allocation2 + $0x248] ss:$72 sps:$4 sm:$0xff]  }
  0x11   :  { %785 = vmatpush1.bf16.msra.mxu0 %v1522_v3  ;;  %826 = vmatpush1.bf16.msra.mxu1 %v1523_v4  ;;  %v1528_v7 = vld [vmem:[#allocation2 + $0x240] ss:$72 sps:$4 sm:$0xff]   ;;  %v1530_v9 = vld [vmem:[#allocation2 + $0x1b4] ss:$72 sps:$4 sm:$0xff]   ;;  %v1534_v11 = vld [vmem:[#allocation2 + $0x1b0] ss:$72 sps:$4 sm:$0xff]  }
  0x12   :  { %786 = vmatprep.subr.bf16.mxu0 %v1524_v5  ;;  %827 = vmatprep.subr.bf16.mxu1 %v1526_v6  ;;  %v1532_v10 = vld [vmem:[#allocation2 + $0x1bc] ss:$72 sps:$4 sm:$0xff]   ;;  %v1535_v12 = vld [vmem:[#allocation2 + $0x1b8] ss:$72 sps:$4 sm:$0xff]   ;;  %v1538_v14 = vld [vmem:[#allocation2 + $0x12c] ss:$72 sps:$4 sm:$0xff]  }
  0x13   :  { %v1536_v13 = vld [vmem:[#allocation2 + $0x124] ss:$72 sps:$4 sm:$0xff]   ;;  %v1540_v15 = vld [vmem:[#allocation2 + $0x120] ss:$72 sps:$4 sm:$0xff]   ;;  %v1542_v17 = vld [vmem:[#allocation2 + $0x94] ss:$72 sps:$4 sm:$0xff]  }
  0x14   :  { %v1541_v16 = vld [vmem:[#allocation2 + $0x128] ss:$72 sps:$4 sm:$0xff]   ;;  %v1544_v18 = vld [vmem:[#allocation2 + $0x9c] ss:$72 sps:$4 sm:$0xff]   ;;  %v1547_v20 = vld [vmem:[#allocation2 + $0x98] ss:$72 sps:$4 sm:$0xff]  }
  0x15   :  { %787 = vmatpush1.bf16.msra.mxu0 %v1528_v7  ;;  %828 = vmatpush1.bf16.msra.mxu1 %v1529_v8  ;;  %v1546_v19 = vld [vmem:[#allocation2 + $0x90] ss:$72 sps:$4 sm:$0xff]   ;;  %v1548_v21 = vld [vmem:[#allocation2 + $0x4] ss:$72 sps:$4 sm:$0xff]   ;;  %v1552_v23 = vld [vmem:[#allocation2] ss:$72 sps:$4 sm:$0xff]  }
  0x16   :  { %788 = vmatprep.subr.bf16.mxu0 %v1530_v9  ;;  %829 = vmatprep.subr.bf16.mxu1 %v1532_v10  ;;  %v1550_v22 = vld [vmem:[#allocation2 + $0xc] ss:$72 sps:$4 sm:$0xff]   ;;  %v1553_v24 = vld [vmem:[#allocation2 + $0x8] ss:$72 sps:$4 sm:$0xff]   ;;  %v30_v25 = vld [vmem:[%s1932_s0] sm:$0x1] }
  0x17   :  { %v1556_v26 = vld [vmem:[#allocation2 + $0x2e4] ss:$72 sps:$4 sm:$0xff]   ;;  %v1830_v28 = vpack.c.bf16 %v30_v25, %v30_v25  ;;  %v1554_v29 = vld [vmem:[#allocation2 + $0x2e0] ss:$72 sps:$4 sm:$0xff]   ;;  %v1562_v31 = vld [vmem:[#allocation2 + $0x254] ss:$72 sps:$4 sm:$0xff]  }
  0x18   :  { %v1559_v27 = vld [vmem:[#allocation2 + $0x2ec] ss:$72 sps:$4 sm:$0xff]   ;;  %v1557_v30 = vld [vmem:[#allocation2 + $0x2e8] ss:$72 sps:$4 sm:$0xff]   ;;  %v1565_v32 = vld [vmem:[#allocation2 + $0x25c] ss:$72 sps:$4 sm:$0xff]  }
  0x19   :  { %789 = vmatpush1.bf16.msra.mxu0 %v1534_v11  ;;  %830 = vmatpush1.bf16.msra.mxu1 %v1535_v12  ;;  %v1560_v33 = vld [vmem:[#allocation2 + $0x250] ss:$72 sps:$4 sm:$0xff]   ;;  %v1568_v35 = vld [vmem:[#allocation2 + $0x1c4] ss:$72 sps:$4 sm:$0xff]   ;;  %v1566_v37 = vld [vmem:[#allocation2 + $0x1c0] ss:$72 sps:$4 sm:$0xff]  }
  0x1a   :  { %790 = vmatprep.subr.bf16.mxu0 %v1536_v13  ;;  %831 = vmatprep.subr.bf16.mxu1 %v1538_v14  ;;  %v1563_v34 = vld [vmem:[#allocation2 + $0x258] ss:$72 sps:$4 sm:$0xff]   ;;  %v1571_v36 = vld [vmem:[#allocation2 + $0x1cc] ss:$72 sps:$4 sm:$0xff]   ;;  %v1569_v38 = vld [vmem:[#allocation2 + $0x1c8] ss:$72 sps:$4 sm:$0xff]  }
  0x1b   :  { %v1574_v39 = vld [vmem:[#allocation2 + $0x134] ss:$72 sps:$4 sm:$0xff]   ;;  %v1572_v41 = vld [vmem:[#allocation2 + $0x130] ss:$72 sps:$4 sm:$0xff]   ;;  %v1580_v43 = vld [vmem:[#allocation2 + $0xa4] ss:$72 sps:$4 sm:$0xff]  }
  0x1c   :  { %v1577_v40 = vld [vmem:[#allocation2 + $0x13c] ss:$72 sps:$4 sm:$0xff]   ;;  %v1575_v42 = vld [vmem:[#allocation2 + $0x138] ss:$72 sps:$4 sm:$0xff]   ;;  %v1583_v44 = vld [vmem:[#allocation2 + $0xac] ss:$72 sps:$4 sm:$0xff]  }
  0x1d   :  { %791 = vmatpush1.bf16.msra.mxu0 %v1540_v15  ;;  %832 = vmatpush1.bf16.msra.mxu1 %v1541_v16  ;;  %v1578_v45 = vld [vmem:[#allocation2 + $0xa0] ss:$72 sps:$4 sm:$0xff]   ;;  %v1586_v47 = vld [vmem:[#allocation2 + $0x14] ss:$72 sps:$4 sm:$0xff]   ;;  %v1584_v49 = vld [vmem:[#allocation2 + $0x10] ss:$72 sps:$4 sm:$0xff]  }
  0x1e   :  { %792 = vmatprep.subr.bf16.mxu0 %v1542_v17  ;;  %833 = vmatprep.subr.bf16.mxu1 %v1544_v18  ;;  %v1581_v46 = vld [vmem:[#allocation2 + $0xa8] ss:$72 sps:$4 sm:$0xff]   ;;  %v1589_v48 = vld [vmem:[#allocation2 + $0x1c] ss:$72 sps:$4 sm:$0xff]   ;;  %v1587_v50 = vld [vmem:[#allocation2 + $0x18] ss:$72 sps:$4 sm:$0xff]  }
  0x1f   :  { %v1592_v51 = vld [vmem:[#allocation2 + $0x2f4] ss:$72 sps:$4 sm:$0xff]   ;;  %v1590_v53 = vld [vmem:[#allocation2 + $0x2f0] ss:$72 sps:$4 sm:$0xff]   ;;  %v1598_v55 = vld [vmem:[#allocation2 + $0x264] ss:$72 sps:$4 sm:$0xff]  }
  0x20   :  { %v1595_v52 = vld [vmem:[#allocation2 + $0x2fc] ss:$72 sps:$4 sm:$0xff]   ;;  %v1593_v54 = vld [vmem:[#allocation2 + $0x2f8] ss:$72 sps:$4 sm:$0xff]   ;;  %v1601_v56 = vld [vmem:[#allocation2 + $0x26c] ss:$72 sps:$4 sm:$0xff]  }
  0x21   :  { %793 = vmatpush1.bf16.msra.mxu0 %v1546_v19  ;;  %834 = vmatpush1.bf16.msra.mxu1 %v1547_v20  ;;  %v1596_v57 = vld [vmem:[#allocation2 + $0x260] ss:$72 sps:$4 sm:$0xff]   ;;  %v1604_v59 = vld [vmem:[#allocation2 + $0x1d4] ss:$72 sps:$4 sm:$0xff]   ;;  %v1602_v61 = vld [vmem:[#allocation2 + $0x1d0] ss:$72 sps:$4 sm:$0xff]  }
  0x22   :  { %794 = vmatprep.subr.bf16.mxu0 %v1548_v21  ;;  %835 = vmatprep.subr.bf16.mxu1 %v1550_v22  ;;  %v1599_v58 = vld [vmem:[#allocation2 + $0x268] ss:$72 sps:$4 sm:$0xff]   ;;  %v1607_v60 = vld [vmem:[#allocation2 + $0x1dc] ss:$72 sps:$4 sm:$0xff]   ;;  %v1605_v62 = vld [vmem:[#allocation2 + $0x1d8] ss:$72 sps:$4 sm:$0xff]  }
  0x23   :  { %v1610_v63 = vld [vmem:[#allocation2 + $0x144] ss:$72 sps:$4 sm:$0xff]   ;;  %v1608_v2 = vld [vmem:[#allocation2 + $0x140] ss:$72 sps:$4 sm:$0xff]   ;;  %v1616_v4 = vld [vmem:[#allocation2 + $0xb4] ss:$72 sps:$4 sm:$0xff]  }
  0x24   :  { %v1613_v1 = vld [vmem:[#allocation2 + $0x14c] ss:$72 sps:$4 sm:$0xff]   ;;  %v1611_v3 = vld [vmem:[#allocation2 + $0x148] ss:$72 sps:$4 sm:$0xff]   ;;  %v1619_v5 = vld [vmem:[#allocation2 + $0xbc] ss:$72 sps:$4 sm:$0xff]  }
  0x25   :  { %795 = vmatpush1.bf16.msra.mxu0 %v1552_v23  ;;  %836 = vmatpush1.bf16.msra.mxu1 %v1553_v24  ;;  %v1614_v6 = vld [vmem:[#allocation2 + $0xb0] ss:$72 sps:$4 sm:$0xff]   ;;  %v1622_v8 = vld [vmem:[#allocation2 + $0x24] ss:$72 sps:$4 sm:$0xff]   ;;  %v1620_v10 = vld [vmem:[#allocation2 + $0x20] ss:$72 sps:$4 sm:$0xff]  }
  0x26   :  { %866 = vmatprep.subr.bf16.mxu0 %v1556_v26  ;;  %907 = vmatprep.subr.bf16.mxu1 %v1559_v27  ;;  %v1617_v7 = vld [vmem:[#allocation2 + $0xb8] ss:$72 sps:$4 sm:$0xff]   ;;  %v1625_v9 = vld [vmem:[#allocation2 + $0x2c] ss:$72 sps:$4 sm:$0xff]   ;;  %v1623_v11 = vld [vmem:[#allocation2 + $0x28] ss:$72 sps:$4 sm:$0xff]  }
  0x27   :  { %v1628_v12 = vld [vmem:[#allocation2 + $0x304] ss:$72 sps:$4 sm:$0xff]   ;;  %v1626_v14 = vld [vmem:[#allocation2 + $0x300] ss:$72 sps:$4 sm:$0xff]   ;;  %v1634_v16 = vld [vmem:[#allocation2 + $0x274] ss:$72 sps:$4 sm:$0xff]  }
  0x28   :  { %1503 = vmatmul.mubr.msk.bf16.vlgmr.msra.gmra.mxu0 %vm776_vm0, %v1830_v28  ;;  %1504 = vmatmul.mubr.msk.bf16.vlgmr.msra.gmra.mxu1 %vm776_vm0, %v1830_v28  ;;  %v1631_v13 = vld [vmem:[#allocation2 + $0x30c] ss:$72 sps:$4 sm:$0xff]   ;;  %v1629_v15 = vld [vmem:[#allocation2 + $0x308] ss:$72 sps:$4 sm:$0xff]   ;;  %v1637_v17 = vld [vmem:[#allocation2 + $0x27c] ss:$72 sps:$4 sm:$0xff]  }
  0x29   :  { %867 = vmatpush1.bf16.msra.mxu0 %v1554_v29  ;;  %908 = vmatpush1.bf16.msra.mxu1 %v1557_v30  ;;  %v1632_v18 = vld [vmem:[#allocation2 + $0x270] ss:$72 sps:$4 sm:$0xff]   ;;  %v1640_v20 = vld [vmem:[#allocation2 + $0x1e4] ss:$72 sps:$4 sm:$0xff]   ;;  %v1638_v22 = vld [vmem:[#allocation2 + $0x1e0] ss:$72 sps:$4 sm:$0xff]  }
  0x2a   :  { %868 = vmatprep.subr.bf16.mxu0 %v1562_v31  ;;  %909 = vmatprep.subr.bf16.mxu1 %v1565_v32  ;;  %v1635_v19 = vld [vmem:[#allocation2 + $0x278] ss:$72 sps:$4 sm:$0xff]   ;;  %v1643_v21 = vld [vmem:[#allocation2 + $0x1ec] ss:$72 sps:$4 sm:$0xff]   ;;  %v1641_v23 = vld [vmem:[#allocation2 + $0x1e8] ss:$72 sps:$4 sm:$0xff]  }
  0x2b   :  { %894 = vmatprep.mubr.bf16.mxu0 %v1799_v0  ;;  %935 = vmatprep.mubr.bf16.mxu1 %v1799_v0  ;;  %v1646_v24 = vld [vmem:[#allocation2 + $0x154] ss:$72 sps:$4 sm:$0xff]   ;;  %v1644_v26 = vld [vmem:[#allocation2 + $0x150] ss:$72 sps:$4 sm:$0xff]   ;;  %v1652_v29 = vld [vmem:[#allocation2 + $0xc4] ss:$72 sps:$4 sm:$0xff]  }
  0x2c   :  { %v1649_v25 = vld [vmem:[#allocation2 + $0x15c] ss:$72 sps:$4 sm:$0xff]   ;;  %v1647_v27 = vld [vmem:[#allocation2 + $0x158] ss:$72 sps:$4 sm:$0xff]   ;;  %v1655_v30 = vld [vmem:[#allocation2 + $0xcc] ss:$72 sps:$4 sm:$0xff]  }
  0x2d   :  { %869 = vmatpush1.bf16.msra.mxu0 %v1560_v33  ;;  %910 = vmatpush1.bf16.msra.mxu1 %v1563_v34  ;;  %v1650_v31 = vld [vmem:[#allocation2 + $0xc0] ss:$72 sps:$4 sm:$0xff]   ;;  %v1658_v33 = vld [vmem:[#allocation2 + $0x34] ss:$72 sps:$4 sm:$0xff]  }
  0x2e   :  { %870 = vmatprep.subr.bf16.mxu0 %v1568_v35  ;;  %911 = vmatprep.subr.bf16.mxu1 %v1571_v36  ;;  %v1653_v32 = vld [vmem:[#allocation2 + $0xc8] ss:$72 sps:$4 sm:$0xff]   ;;  %v1661_v34 = vld [vmem:[#allocation2 + $0x3c] ss:$72 sps:$4 sm:$0xff]   ;;  %v1659_v36 = vld [vmem:[#allocation2 + $0x38] ss:$72 sps:$4 sm:$0xff]  }
  0x2f   :  { %v1656_v35 = vld [vmem:[#allocation2 + $0x30] ss:$72 sps:$4 sm:$0xff]  }
  0x31   :  { %871 = vmatpush1.bf16.msra.mxu0 %v1566_v37  ;;  %912 = vmatpush1.bf16.msra.mxu1 %v1569_v38  ;;  %v1664_v37 = vld [vmem:[#allocation2 + $0x314] ss:$72 sps:$4 sm:$0xff]   ;;  %v1662_v38 = vld [vmem:[#allocation2 + $0x310] ss:$72 sps:$4 sm:$0xff]  }
  0x32   :  { %872 = vmatprep.subr.bf16.mxu0 %v1574_v39  ;;  %913 = vmatprep.subr.bf16.mxu1 %v1577_v40  ;;  %v1667_v39 = vld [vmem:[#allocation2 + $0x284] ss:$72 sps:$4 sm:$0xff]   ;;  %v1665_v40 = vld [vmem:[#allocation2 + $0x280] ss:$72 sps:$4 sm:$0xff]  }
  0x35   :  { %873 = vmatpush1.bf16.msra.mxu0 %v1572_v41  ;;  %914 = vmatpush1.bf16.msra.mxu1 %v1575_v42  ;;  %v1670_v41 = vld [vmem:[#allocation2 + $0x1f4] ss:$72 sps:$4 sm:$0xff]   ;;  %v1668_v42 = vld [vmem:[#allocation2 + $0x1f0] ss:$72 sps:$4 sm:$0xff]  }
  0x36   :  { %874 = vmatprep.subr.bf16.mxu0 %v1580_v43  ;;  %915 = vmatprep.subr.bf16.mxu1 %v1583_v44  ;;  %v1673_v43 = vld [vmem:[#allocation2 + $0x164] ss:$72 sps:$4 sm:$0xff]   ;;  %v1671_v44 = vld [vmem:[#allocation2 + $0x160] ss:$72 sps:$4 sm:$0xff]  }
  0x39   :  { %875 = vmatpush1.bf16.msra.mxu0 %v1578_v45  ;;  %916 = vmatpush1.bf16.msra.mxu1 %v1581_v46  ;;  %v1676_v45 = vld [vmem:[#allocation2 + $0xd4] ss:$72 sps:$4 sm:$0xff]   ;;  %v1674_v46 = vld [vmem:[#allocation2 + $0xd0] ss:$72 sps:$4 sm:$0xff]  }
  0x3a   :  { %876 = vmatprep.subr.bf16.mxu0 %v1586_v47  ;;  %917 = vmatprep.subr.bf16.mxu1 %v1589_v48  ;;  %v1679_v47 = vld [vmem:[#allocation2 + $0x44] ss:$72 sps:$4 sm:$0xff]   ;;  %v1677_v48 = vld [vmem:[#allocation2 + $0x40] ss:$72 sps:$4 sm:$0xff]  }
  0x3d   :  { %877 = vmatpush1.bf16.msra.mxu0 %v1584_v49  ;;  %918 = vmatpush1.bf16.msra.mxu1 %v1587_v50 }
  0x3e   :  { %948 = vmatprep.subr.bf16.mxu0 %v1592_v51  ;;  %989 = vmatprep.subr.bf16.mxu1 %v1595_v52  ;;  %v140_v51 = vld [vmem:[%s1934_s2] sm:$0xff] }
  0x40   :  { %1505 = vmatmul.mubr.msk.bf16.vlgmr.msra.gmra.mxu0 %vm776_vm0, %v1830_v28  ;;  %1506 = vmatmul.mubr.msk.bf16.vlgmr.msra.gmra.mxu1 %vm776_vm0, %v1830_v28 }
  0x41   :  { %949 = vmatpush1.bf16.msra.mxu0 %v1590_v53  ;;  %990 = vmatpush1.bf16.msra.mxu1 %v1593_v54 }
  0x42   :  { %950 = vmatprep.subr.bf16.mxu0 %v1598_v55  ;;  %991 = vmatprep.subr.bf16.mxu1 %v1601_v56 }
  0x43   :  { %976 = vmatprep.mubr.bf16.mxu0 %v1799_v0  ;;  %1017 = vmatprep.mubr.bf16.mxu1 %v1799_v0 }
  0x45   :  { %951 = vmatpush1.bf16.msra.mxu0 %v1596_v57  ;;  %992 = vmatpush1.bf16.msra.mxu1 %v1599_v58 }
  0x46   :  { %952 = vmatprep.subr.bf16.mxu0 %v1604_v59  ;;  %993 = vmatprep.subr.bf16.mxu1 %v1607_v60 }
  0x49   :  { %953 = vmatpush1.bf16.msra.mxu0 %v1602_v61  ;;  %994 = vmatpush1.bf16.msra.mxu1 %v1605_v62 }
  0x4a   :  { %954 = vmatprep.subr.bf16.mxu0 %v1610_v63  ;;  %995 = vmatprep.subr.bf16.mxu1 %v1613_v1 }
  0x4d   :  { %955 = vmatpush1.bf16.msra.mxu0 %v1608_v2  ;;  %996 = vmatpush1.bf16.msra.mxu1 %v1611_v3 }
  0x4e   :  { %956 = vmatprep.subr.bf16.mxu0 %v1616_v4  ;;  %997 = vmatprep.subr.bf16.mxu1 %v1619_v5 }
  0x51   :  { %957 = vmatpush1.bf16.msra.mxu0 %v1614_v6  ;;  %998 = vmatpush1.bf16.msra.mxu1 %v1617_v7 }
  0x52   :  { %958 = vmatprep.subr.bf16.mxu0 %v1622_v8  ;;  %999 = vmatprep.subr.bf16.mxu1 %v1625_v9 }
  0x55   :  { %959 = vmatpush1.bf16.msra.mxu0 %v1620_v10  ;;  %1000 = vmatpush1.bf16.msra.mxu1 %v1623_v11 }
  0x56   :  { %1030 = vmatprep.subr.bf16.mxu0 %v1628_v12  ;;  %1071 = vmatprep.subr.bf16.mxu1 %v1631_v13 }
  0x58   :  { %1507 = vmatmul.mubr.msk.bf16.vlgmr.msra.gmra.mxu0 %vm776_vm0, %v1830_v28  ;;  %1508 = vmatmul.mubr.msk.bf16.vlgmr.msra.gmra.mxu1 %vm776_vm0, %v1830_v28 }
  0x59   :  { %1031 = vmatpush1.bf16.msra.mxu0 %v1626_v14  ;;  %1072 = vmatpush1.bf16.msra.mxu1 %v1629_v15 }
  0x5a   :  { %1032 = vmatprep.subr.bf16.mxu0 %v1634_v16  ;;  %1073 = vmatprep.subr.bf16.mxu1 %v1637_v17 }
  0x5b   :  { %1058 = vmatprep.mubr.bf16.mxu0 %v1799_v0  ;;  %1099 = vmatprep.mubr.bf16.mxu1 %v1799_v0 }
  0x5d   :  { %1033 = vmatpush1.bf16.msra.mxu0 %v1632_v18  ;;  %1074 = vmatpush1.bf16.msra.mxu1 %v1635_v19 }
  0x5e   :  { %1034 = vmatprep.subr.bf16.mxu0 %v1640_v20  ;;  %1075 = vmatprep.subr.bf16.mxu1 %v1643_v21 }
  0x61   :  { %1035 = vmatpush1.bf16.msra.mxu0 %v1638_v22  ;;  %1076 = vmatpush1.bf16.msra.mxu1 %v1641_v23 }
  0x62   :  { %1036 = vmatprep.subr.bf16.mxu0 %v1646_v24  ;;  %1077 = vmatprep.subr.bf16.mxu1 %v1649_v25 }
  0x65   :  { %1037 = vmatpush1.bf16.msra.mxu0 %v1644_v26  ;;  %1078 = vmatpush1.bf16.msra.mxu1 %v1647_v27 }
  0x66   :  { %1038 = vmatprep.subr.bf16.mxu0 %v1652_v29  ;;  %1079 = vmatprep.subr.bf16.mxu1 %v1655_v30 }
  0x69   :  { %1039 = vmatpush1.bf16.msra.mxu0 %v1650_v31  ;;  %1080 = vmatpush1.bf16.msra.mxu1 %v1653_v32 }
  0x6a   :  { %1040 = vmatprep.subr.bf16.mxu0 %v1658_v33  ;;  %1081 = vmatprep.subr.bf16.mxu1 %v1661_v34 }
  0x6d   :  { %1041 = vmatpush1.bf16.msra.mxu0 %v1656_v35  ;;  %1082 = vmatpush1.bf16.msra.mxu1 %v1659_v36 }
  0x6e   :  { %1112 = vmatprep.subr.bf16.mxu0 %v1664_v37 }
  0x70   :  { %1509 = vmatmul.mubr.msk.bf16.vlgmr.msra.gmra.mxu0 %vm776_vm0, %v1830_v28  ;;  %1510 = vmatmul.mubr.msk.bf16.vlgmr.msra.gmra.mxu1 %vm776_vm0, %v1830_v28 }
  0x71   :  { %1113 = vmatpush1.bf16.msra.mxu0 %v1662_v38  ;;  %1140 = vmatprep.mubr.bf16.mxu0 %v1799_v0  ;;  %v686_v0 = vlaneseq }
  0x72   :  { %1114 = vmatprep.subr.bf16.mxu0 %v1667_v39 }
  0x73   :  { %v1858_v49 = vshrl.u32 %v686_v0, 7  ;;  %vm1377_vm1 = vcmp.lt.s32.totalorder %v686_v0, 256 }
  0x75   :  { %1115 = vmatpush1.bf16.msra.mxu0 %v1665_v40  ;;  %v1861_v50 = vsub.s32 0, %v1858_v49  ;;  %v696_v53 = vsub.s32 2, %v1858_v49  ;;  %v1868_v55 = vsub.s32 1, %v1858_v49  ;;  %v704_v14 = vsub.s32 4, %v1858_v49 }
  0x76   :  { %1116 = vmatprep.subr.bf16.mxu0 %v1670_v41  ;;  %v712_v15 = vsub.s32 6, %v1858_v49  ;;  %v708_v17 = vsub.s32 5, %v1858_v49  ;;  %v716_v18 = vsub.s32 7, %v1858_v49 }
  0x77   :  { %v689_v58 = vrot.slane %v140_v51, %v1861_v50  ;;  %v697_v59 = vrot.slane %v140_v51, %v696_v53  ;;  %v693_v62 = vrot.slane %v140_v51, %v1868_v55  ;;  %v705_v19 = vrot.slane %v140_v51, %v704_v14 }
  0x78   :  { %v713_v20 = vrot.slane %v140_v51, %v712_v15  ;;  %v709_v21 = vrot.slane %v140_v51, %v708_v17  ;;  %v717_v22 = vrot.slane %v140_v51, %v716_v18 }
  0x79   :  { %1117 = vmatpush1.bf16.msra.mxu0 %v1668_v42 }
  0x7a   :  { %1118 = vmatprep.subr.bf16.mxu0 %v1673_v43 }
  0x7d   :  { %1119 = vmatpush1.bf16.msra.mxu0 %v1671_v44 }
  0x7e   :  { %1120 = vmatprep.subr.bf16.mxu0 %v1676_v45 }
  0x81   :  { %1121 = vmatpush1.bf16.msra.mxu0 %v1674_v46 }
  0x82   :  { %1122 = vmatprep.subr.bf16.mxu0 %v1679_v47 }
  0x85   :  { %1123 = vmatpush1.bf16.msra.mxu0 %v1677_v48 }
  0x88   :  { %1511 = vmatmul.mubr.msk.bf16.vlgmr.msra.gmra.mxu0 %vm776_vm0, %v1830_v28  ;;  %v700_v28 = vsub.s32 3, %v1858_v49 }
  0x8a   :  { %v701_v63 = vrot.slane %v140_v51, %v700_v28 }
  0xe8   :  { %v814_v52 = vpop.f32.mrf.mxu0  ;;  %v855_v54 = vpop.f32.mrf.mxu1 }
  0xe9   :  { %v815_v3 = vadd.f32 %v814_v52, %v689_v58  ;;  %v856_v4 = vadd.f32 %v855_v54, %v697_v59 }
  0xea   :  { %v816_v56 = vpop.f32.mrf.mxu0  ;;  %v857_v57 = vpop.f32.mrf.mxu1 }
  0xeb   :  { %v817_v5 = vadd.f32 %v816_v56, %v693_v62  ;;  %v858_v6 = vadd.f32 %v857_v57, %v701_v63  ;;  %v1149_v7 = vsub.f32 0.0, %v815_v3  ;;  %v1151_v8 = vsub.f32 0.0, %v856_v4 }
  0xec   :  { %v818_v60 = vpop.f32.mrf.mxu0  ;;  %v859_v61 = vpop.f32.mrf.mxu1  ;;  %v1800_v4 = vmov 1966171168  }
  0xed   :  { %v1150_v9 = vsub.f32 0.0, %v817_v5  ;;  %v1152_v10 = vsub.f32 0.0, %v858_v6  ;;  %v1167_v11 = vmul.f32 1.442695, %v1149_v7  ;;  %v1171_v12 = vmul.f32 1.442695, %v1151_v8 }
  0xee   :  { %v819_v1 = vpop.f32.mrf.mxu0  ;;  %v860_v2 = vpop.f32.mrf.mxu1  ;;  %v1262_v5 = vunpack.c.l.s4 %v1800_v4 }
  0xef   :  { %v1169_v13 = vmul.f32 1.442695, %v1150_v9  ;;  %v1173_v16 = vmul.f32 1.442695, %v1152_v10  ;;  %1680 = vpow2.f32 %v1167_v11  ;;  %v141_v1 = vld [vmem:[%s1934_s2 + $0x8] sm:$0xff] }
  0xf0   :  { %1682 = vpow2.f32 %v1171_v12  ;;  %v721_v8 = vrot.slane %v141_v1, %v1861_v50  ;;  %v729_v10 = vrot.slane %v141_v1, %v696_v53 }
  0xf1   :  { %1684 = vpow2.f32 %v1169_v13 }
  0xf2   :  { %1686 = vpow2.f32 %v1173_v16  ;;  %v725_v16 = vrot.slane %v141_v1, %v1868_v55 }
  0xfc   :  { %v1681_v44 = vpop.eup %1680 }
  0xfd   :  { %v1683_v45 = vpop.eup %1682  ;;  %v1203_v48 = vadd.f32 1.0, %v1681_v44 }
  0xfe   :  { %v1685_v46 = vpop.eup %1684  ;;  %v1205_v51 = vadd.f32 1.0, %v1683_v45 }
  0xff   :  { %v1687_v47 = vpop.eup %1686  ;;  %v1204_v52 = vadd.f32 1.0, %v1685_v46 }
 0x100   :  { %v896_v23 = vpop.f32.mrf.mxu0  ;;  %v937_v24 = vpop.f32.mrf.mxu1  ;;  %v1206_v54 = vadd.f32 1.0, %v1687_v47 }
 0x101   :  { %v897_v25 = vadd.f32 %v896_v23, %v705_v19  ;;  %v938_v26 = vadd.f32 %v937_v24, %v713_v20  ;;  %v1263_v20 = vunpack.c.0.s8 %v1262_v5 }
 0x102   :  { %v898_v27 = vpop.f32.mrf.mxu0  ;;  %v939_v29 = vpop.f32.mrf.mxu1 }
 0x103   :  { %v1153_v30 = vsub.f32 0.0, %v897_v25  ;;  %v1155_v31 = vsub.f32 0.0, %v938_v26  ;;  %v899_v32 = vadd.f32 %v898_v27, %v709_v21  ;;  %v940_v33 = vadd.f32 %v939_v29, %v717_v22 }
 0x104   :  { %v900_v34 = vpop.f32.mrf.mxu0  ;;  %v941_v35 = vpop.f32.mrf.mxu1  ;;  %v733_v21 = vrot.slane %v141_v1, %v700_v28  ;;  %v1899_v29 = vsub.s32 %v1263_v20, %v1858_v49 }
 0x105   :  { %v1175_v36 = vmul.f32 1.442695, %v1153_v30  ;;  %v1179_v37 = vmul.f32 1.442695, %v1155_v31  ;;  %v1154_v38 = vsub.f32 0.0, %v899_v32  ;;  %v1156_v39 = vsub.f32 0.0, %v940_v33 }
 0x106   :  { %v901_v40 = vpop.f32.mrf.mxu0  ;;  %v942_v41 = vpop.f32.mrf.mxu1 }
 0x107   :  { %1688 = vpow2.f32 %v1175_v36  ;;  %v1177_v42 = vmul.f32 1.442695, %v1154_v38  ;;  %v1181_v43 = vmul.f32 1.442695, %v1156_v39 }
 0x108   :  { %1690 = vpow2.f32 %v1179_v37 }
 0x109   :  { %1692 = vpow2.f32 %v1177_v42 }
 0x10a   :  { %1694 = vpow2.f32 %v1181_v43 }
 0x10b   :  { %1696 = vrcp.f32 %v1203_v48 }
 0x10c   :  { %1698 = vrcp.f32 %v1205_v51 }
 0x10d   :  { %1700 = vrcp.f32 %v1204_v52 }
 0x10e   :  { %1702 = vrcp.f32 %v1206_v54  ;;  %v737_v54 = vrot.slane %v141_v1, %v704_v14 }
 0x114   :  { %v1689_v56 = vpop.eup %1688 }
 0x115   :  { %v1691_v57 = vpop.eup %1690  ;;  %v1207_v58 = vadd.f32 1.0, %v1689_v56  ;;  %v745_v56 = vrot.slane %v141_v1, %v712_v15 }
 0x116   :  { %v1693_v59 = vpop.eup %1692  ;;  %v1209_v60 = vadd.f32 1.0, %v1691_v57 }
 0x117   :  { %v1695_v61 = vpop.eup %1694  ;;  %1704 = vrcp.f32 %v1207_v58  ;;  %v1208_v62 = vadd.f32 1.0, %v1693_v59  ;;  %v741_v59 = vrot.slane %v141_v1, %v708_v17 }
 0x118   :  { %1706 = vrcp.f32 %v1209_v60  ;;  %v1210_v63 = vadd.f32 1.0, %v1695_v61  ;;  %v978_v2 = vpop.f32.mrf.mxu0  ;;  %v1019_v3 = vpop.f32.mrf.mxu1  ;;  %v749_v60 = vrot.slane %v141_v1, %v716_v18 }
 0x119   :  { %1708 = vrcp.f32 %v1208_v62  ;;  %v1697_v9 = vpop.eup %1696  ;;  %v979_v25 = vadd.f32 %v978_v2, %v721_v8  ;;  %v1020_v26 = vadd.f32 %v1019_v3, %v729_v10 }
 0x11a   :  { %1710 = vrcp.f32 %v1210_v63  ;;  %v980_v6 = vpop.f32.mrf.mxu0  ;;  %v1021_v7 = vpop.f32.mrf.mxu1 }
 0x11b   :  { %v1699_v13 = vpop.eup %1698  ;;  %v981_v27 = vadd.f32 %v980_v6, %v725_v16  ;;  %v1022_v53 = vadd.f32 %v1021_v7, %v733_v21  ;;  %v1157_v32 = vsub.f32 0.0, %v979_v25  ;;  %v1159_v34 = vsub.f32 0.0, %v1020_v26  ;;  %v142_v26 = vld [vmem:[%s1934_s2 + $0x10] sm:$0x3]  ;;  %s1801_s2 = smov [#allocation5]  }
 0x11c   :  { %v982_v11 = vpop.f32.mrf.mxu0  ;;  %v1023_v12 = vpop.f32.mrf.mxu1  ;;  %s1386_s25 = sshll.u32 %s1801_s2, 4  ;;  %s1387_s25 = int_to_ptr.vmem [resolvable:$true] %s1386_s25 }
 0x11d   :  { %v1701_v19 = vpop.eup %1700  ;;  %v1158_v36 = vsub.f32 0.0, %v981_v27  ;;  %v1160_v38 = vsub.f32 0.0, %v1022_v53  ;;  %v1183_v41 = vmul.f32 1.442695, %v1157_v32  ;;  %v1187_v43 = vmul.f32 1.442695, %v1159_v34  ;;  %p1777_p6 = scmp.lt.s32.totalorder %s1387_s25, %s1387_s25 }
 0x11e   :  { %v983_v22 = vpop.f32.mrf.mxu0  ;;  %v1024_v23 = vpop.f32.mrf.mxu1  ;;  %v1257_v30 = vcombine.low %v1697_v9, %v1701_v19  ;;  %s1772_s26 = scalar_lea.vmem %s1387_s25, 288 }
 0x11f   :  { %v1703_v24 = vpop.eup %1702  ;;  %v1185_v45 = vmul.f32 1.442695, %v1158_v36  ;;  %v1189_v47 = vmul.f32 1.442695, %v1160_v38  ;;  %1712 = vpow2.f32 %v1183_v41  ;;  %v757_v36 = vrot.slane %v142_v26, %v1868_v55  ;;  %p1773_p5 = scmp.ne.s32.totalorder %s1387_s25, %s1772_s26  ;;  %p1778_p7 = scmp.lt.s32.totalorder %s1772_s26, %s1772_s26 }
 0x120   :  { %v1258_v31 = vcombine.low %v1699_v13, %v1703_v24  ;;  %v1267_v28 = vrot.slane %v1257_v30, %v1899_v29  ;;  %1714 = vpow2.f32 %v1187_v43 }
 0x121   :  { %1716 = vpow2.f32 %v1185_v45  ;;  %p1779_p8 = por %p1778_p7, %p1777_p6 }
 0x122   :  { %v1274_v39 = vrot.slane %v1258_v31, %v1899_v29  ;;  %1718 = vpow2.f32 %v1189_v47  ;;  %v753_v31 = vrot.slane %v142_v26, %v1861_v50 }
 0x123   :  { %p1780_p9 = pnand %p1779_p8, %p1773_p5 }
 0x124   :  { %v1705_v33 = vpop.eup %1704  ;;  %v1289_v51 = vcombine.low %v1267_v28, %v1274_v39 }
 0x125   :  { %v1707_v35 = vpop.eup %1706 }
 0x126   :  { %v1709_v37 = vpop.eup %1708  ;;  %v1297_v57 = vrot.slane %v1289_v51, %v1899_v29 }
 0x127   :  { %v1711_v40 = vpop.eup %1710  ;;  %v1259_v42 = vcombine.low %v1705_v33, %v1709_v37 }
 0x128   :  { %v1260_v44 = vcombine.low %v1707_v35, %v1711_v40 }
 0x129   :  { %v1281_v46 = vrot.slane %v1259_v42, %v1899_v29 }
 0x12a   :  { %v1288_v48 = vrot.slane %v1260_v44, %v1899_v29 }
 0x12c   :  { %v1290_v52 = vcombine.low %v1281_v46, %v1288_v48  ;;  %v1713_v16 = vpop.eup %1712 }
 0x12d   :  { %v1715_v19 = vpop.eup %1714  ;;  %v1211_v22 = vadd.f32 1.0, %v1713_v16 }
 0x12e   :  { %v1304_v58 = vrot.slane %v1290_v52, %v1899_v29  ;;  %v1717_v20 = vpop.eup %1716  ;;  %v1213_v23 = vadd.f32 1.0, %v1715_v19 }
 0x12f   :  { %v1719_v21 = vpop.eup %1718  ;;  %v1212_v24 = vadd.f32 1.0, %v1717_v20 }
 0x130   :  { %v1060_v61 = vpop.f32.mrf.mxu0  ;;  %v1101_v62 = vpop.f32.mrf.mxu1  ;;  %v1305_v63 = vcombine.low %v1297_v57, %v1304_v58  ;;  %v1214_v25 = vadd.f32 1.0, %v1719_v21 }
 0x131   :  { %v1061_v2 = vadd.f32 %v1060_v61, %v737_v54  ;;  %v1102_v3 = vadd.f32 %v1101_v62, %v745_v56 }
 0x132   :  { %v1062_v14 = vpop.f32.mrf.mxu0  ;;  %v1103_v4 = vpop.f32.mrf.mxu1  ;;  %1373 = vst [vmem:[#allocation5] sm:$0xff] %v1305_v63 }
 0x133   :  { %v1161_v15 = vsub.f32 0.0, %v1061_v2  ;;  %v1163_v5 = vsub.f32 0.0, %v1102_v3  ;;  %v1063_v6 = vadd.f32 %v1062_v14, %v741_v59  ;;  %v1104_v7 = vadd.f32 %v1103_v4, %v749_v60 }
 0x134   :  { %v1064_v8 = vpop.f32.mrf.mxu0  ;;  %v1105_v9 = vpop.f32.mrf.mxu1 }
 0x135   :  { %v1191_v10 = vmul.f32 1.442695, %v1161_v15  ;;  %v1195_v11 = vmul.f32 1.442695, %v1163_v5  ;;  %v1162_v17 = vsub.f32 0.0, %v1063_v6  ;;  %v1164_v12 = vsub.f32 0.0, %v1104_v7 }
 0x136   :  { %v1065_v49 = vpop.f32.mrf.mxu0  ;;  %v1106_v18 = vpop.f32.mrf.mxu1 }
 0x137   :  { %1720 = vpow2.f32 %v1191_v10  ;;  %v1193_v1 = vmul.f32 1.442695, %v1162_v17  ;;  %v1197_v13 = vmul.f32 1.442695, %v1164_v12 }
 0x138   :  { %1722 = vpow2.f32 %v1195_v11 }
 0x139   :  { %1724 = vpow2.f32 %v1193_v1 }
 0x13a   :  { %1726 = vpow2.f32 %v1197_v13 }
 0x13b   :  { %1728 = vrcp.f32 %v1211_v22 }
 0x13c   :  { %1730 = vrcp.f32 %v1213_v23 }
 0x13d   :  { %1732 = vrcp.f32 %v1212_v24 }
 0x13e   :  { %1734 = vrcp.f32 %v1214_v25 }
 0x144   :  { %v1721_v27 = vpop.eup %1720 }
 0x145   :  { %v1723_v53 = vpop.eup %1722  ;;  %v1215_v30 = vadd.f32 1.0, %v1721_v27 }
 0x146   :  { %v1725_v32 = vpop.eup %1724  ;;  %v1217_v33 = vadd.f32 1.0, %v1723_v53 }
 0x147   :  { %v1727_v34 = vpop.eup %1726  ;;  %1736 = vrcp.f32 %v1215_v30  ;;  %v1216_v35 = vadd.f32 1.0, %v1725_v32 }
 0x148   :  { %1738 = vrcp.f32 %v1217_v33  ;;  %v1218_v37 = vadd.f32 1.0, %v1727_v34  ;;  %v1142_v38 = vpop.f32.mrf.mxu0  ;;  %v1729_v42 = vpop.eup %1728 }
 0x149   :  { %1740 = vrcp.f32 %v1216_v35  ;;  %v1143_v28 = vadd.f32 %v1142_v38, %v753_v31  ;;  %v1731_v44 = vpop.eup %1730 }
 0x14a   :  { %1742 = vrcp.f32 %v1218_v37  ;;  %v1144_v39 = vpop.f32.mrf.mxu0  ;;  %v1733_v46 = vpop.eup %1732 }
 0x14b   :  { %v1165_v40 = vsub.f32 0.0, %v1143_v28  ;;  %v1145_v41 = vadd.f32 %v1144_v39, %v757_v36  ;;  %v1735_v48 = vpop.eup %1734  ;;  %v1306_v55 = vcombine.low %v1729_v42, %v1733_v46 }
 0x14c   :  { %v1146_v43 = vpop.f32.mrf.mxu0  ;;  %v1307_v52 = vcombine.low %v1731_v44, %v1735_v48 }
 0x14d   :  { %v1199_v50 = vmul.f32 1.442695, %v1165_v40  ;;  %v1166_v45 = vsub.f32 0.0, %v1145_v41  ;;  %v1316_v58 = vrot.slane %v1306_v55, %v1899_v29 }
 0x14e   :  { %v1147_v47 = vpop.f32.mrf.mxu0  ;;  %v1323_v59 = vrot.slane %v1307_v52, %v1899_v29 }
 0x14f   :  { %1744 = vpow2.f32 %v1199_v50  ;;  %v1201_v51 = vmul.f32 1.442695, %v1166_v45 }
 0x150   :  { %v1338_v3 = vcombine.low %v1316_v58, %v1323_v59 }
 0x151   :  { %1746 = vpow2.f32 %v1201_v51 }
 0x152   :  { %v1346_v6 = vrot.slane %v1338_v3, %v1899_v29 }
 0x154   :  { %v1737_v54 = vpop.eup %1736 }
 0x155   :  { %v1739_v56 = vpop.eup %1738 }
 0x156   :  { %v1741_v57 = vpop.eup %1740 }
 0x157   :  { %v1743_v60 = vpop.eup %1742  ;;  %v1308_v61 = vcombine.low %v1737_v54, %v1741_v57 }
 0x158   :  { %v1309_v62 = vcombine.low %v1739_v56, %v1743_v60 }
 0x159   :  { %v1330_v63 = vrot.slane %v1308_v61, %v1899_v29 }
 0x15a   :  { %v1337_v2 = vrot.slane %v1309_v62, %v1899_v29 }
 0x15c   :  { %v1745_v14 = vpop.eup %1744  ;;  %v1339_v4 = vcombine.low %v1330_v63, %v1337_v2 }
 0x15d   :  { %v1219_v15 = vadd.f32 1.0, %v1745_v14 }
 0x15e   :  { %v1747_v5 = vpop.eup %1746  ;;  %v1353_v7 = vrot.slane %v1339_v4, %v1899_v29 }
 0x15f   :  { %v1220_v8 = vadd.f32 1.0, %v1747_v5  ;;  %1748 = vrcp.f32 %v1219_v15 }
 0x160   :  { %v1354_v9 = vcombine.low %v1346_v6, %v1353_v7 }
 0x161   :  { %1750 = vrcp.f32 %v1220_v8 }
 0x162   :  { %1374 = vst [vmem:[#allocation5 + $0x8] sm:$0xff] %v1354_v9 }
 0x16c   :  { %v1749_v10 = vpop.eup %1748 }
 0x16e   :  { %v1751_v11 = vpop.eup %1750 }
 0x16f   :  { %v1355_v17 = vcombine.low %v1749_v10, %v1751_v11 }
 0x171   :  { %v1362_v12 = vrot.slane %v1355_v17, %v1899_v29 }
 0x173   :  { %v1369_v49 = vrot.slane %v1362_v12, %v1899_v29 }
 0x175   :  { %1379 = vst.msk [vmem:[#allocation5 + $0x10] sm:$0x3] %vm1377_vm1, %v1369_v49 }
 0x176   :  { %1783 = shalt.err (!%p1780_p9)
}
 0x177   :  { %1389 = dma.vmem_to_hbm [thread:$0]  %s1387_s25, 288, %s1935_s3, [#allocation4]  }
 0x178   :  { %1794 = dma.done.wait [#allocation4], 288  }
 0x179   :  { %1795 = vsyncadd [#allocation4], 4294967008 }
 0x17a   :  { %1393 = vsyncpa [#allocation3], 1 }
 0x17b   :  { %1394 = vsyncpa [#allocation4], 1 }

</bundles_post_ra>
